<compile_context>
chip_gen: v7x
topology: tpu7x:2x2x1
jax: 0.10.0
libtpu: 0.0.40
codegen_flags: <defaults>
</compile_context>

<pallas_src>
import numpy as np
import jax
import jax.numpy as jnp
from jax import lax
from jax.experimental import pallas as pl
from jax.experimental.pallas import tpu as pltpu


def _round_up(x, m):
    return (x + m - 1) // m * m


def bigram_fused_kernel(tok_col_ref, pos_col_ref, table_ref, out_ref):
    """One row-block of the folded bigram forward.

    tok_col_ref : (TM, 1)  int32  token id          -> column in [0, V)    of fused table
    pos_col_ref : (TM, 1)  int32  V + (row mod T)   -> column in [V, V+P)  of fused table
    table_ref   : (Kp, Vp) f32    fused logit table: rows = tok_table@W^T + b  ++  pos_table@W^T
    out_ref     : (TM, Vp) f32    lane-dense logits block
    """
    TM = tok_col_ref.shape[0]
    Kp = table_ref.shape[0]

    # Concatenated token/position one-hot.  Token columns live in [0, V), position columns
    # in [V, V+P), so the two one-hots never collide and OR == sum.
    lane = lax.broadcasted_iota(jnp.int32, (TM, Kp), 1)
    onehot = jnp.logical_or(lane == tok_col_ref[...], lane == pos_col_ref[...])
    onehot = onehot.astype(table_ref.dtype)                        # exact 0/1 values

    # Single MXU matmul: gathers both table rows and sums them (bias already folded in).
    out_ref[...] = jnp.dot(onehot, table_ref[...],
                           preferred_element_type=jnp.float32).astype(out_ref.dtype)


def precompute_bigram_params(tok_table, pos_table, w, b, *, max_positions):
    """One-time parameter fold (hoisted out of the per-call path).

    fused_table[v]     = tok_table[v] @ W^T + b     for v in [0, V)
    fused_table[V + p] = pos_table[p] @ W^T         for p in [0, max_positions)
    """
    V, _ = w.shape
    P = int(max_positions)
    hi = lax.Precision.HIGHEST                       # keep the one-time fold in full f32
    tok_logits = jnp.dot(tok_table, w.T, precision=hi) + b          # (V, V)
    pos_logits = jnp.dot(pos_table[:P], w.T, precision=hi)          # (P, V)
    fused = jnp.concatenate([tok_logits, pos_logits], axis=0)       # (V+P, V)

    Kp = _round_up(V + P, 128)
    Vp = _round_up(V, 128)
    fused = jnp.pad(fused, ((0, Kp - (V + P)), (0, Vp - V)))        # zero rows / lanes
    return {"table": fused, "V": V, "P": P, "Vp": Vp}


def bigram_forward(idx, params, *, max_row_block=256):
    """Equivalent of BiGramLanguageModel.forward(idx, targets=None).

    max_row_block=256 fills the v6e/v7x MXU height (use 128 on v5e); with real batch sizes
    this also gives the 'parallel' grid >= 2 steps so both v7x TensorCores get work.
    """
    table = params["table"]
    V, P, Vp = params["V"], params["P"], params["Vp"]
    Kp = table.shape[0]
    B, T = idx.shape
    assert T <= P, "sequence longer than the precomputed position table"

    R = B * T
    TM = min(max_row_block, _round_up(R, 8))          # row block, multiple of 8
    Rp = _round_up(R, TM)

    # Per-call prep only: flatten+pad token ids; positions -> fused-table columns.
    # Positions are row-major: row r (of the flattened (B, T) idx) has position r % T.
    tok_cols = jnp.pad(idx.reshape(-1).astype(jnp.int32), (0, Rp - R)).reshape(Rp, 1)
    pos_cols = jnp.asarray((V + (np.arange(Rp) % T)).astype(np.int32).reshape(Rp, 1))

    logits_pad = pl.pallas_call(
        bigram_fused_kernel,
        out_shape=jax.ShapeDtypeStruct((Rp, Vp), jnp.float32),
        grid=(Rp // TM,),
        in_specs=[
            pl.BlockSpec((TM, 1), lambda i: (i, 0)),      # token column ids (this block)
            pl.BlockSpec((TM, 1), lambda i: (i, 0)),      # position column ids (this block)
            pl.BlockSpec((Kp, Vp), lambda i: (0, 0)),     # fused table, VMEM resident
            # TODO(synk): when V/E scale up (v7x: 64 MiB VMEM), tile the Vp axis with a
            # second grid dim and replace the one-hot gather with a scalar-prefetch row DMA.
        ],
        out_specs=pl.BlockSpec((TM, Vp), lambda i: (i, 0)),
        compiler_params=pltpu.CompilerParams(
            dimension_semantics=("parallel",)),           # row blocks shard across TCs (v7x)
    )(tok_cols, pos_cols, table)

    logits = logits_pad[:R, :V].reshape(B, T, V)
    loss = None
    # TODO(synk): cross-entropy loss branch (targets is not None) not implemented.
    return logits, loss


if __name__ == "__main__":
    key = jax.random.PRNGKey(0)
    k1, k2, k3, k4, k5 = jax.random.split(key, 5)

    vocab_size = 64
    embed_size = 32      # must equal num_embeddings=32 for the pos-add broadcast
    block_size = 256
    B, T = 2, 8

    # Deterministic synthetic parameters (shapes from the module __init__).
    tok_table = jax.random.normal(k1, (vocab_size, embed_size), jnp.float32)   # Embedding(vocab, E)
    pos_table = jax.random.normal(k2, (block_size, embed_size), jnp.float32)   # Embedding(block_size, 32)
    bound = 1.0 / float(embed_size) ** 0.5
    w = jax.random.uniform(k3, (vocab_size, embed_size), jnp.float32, -bound, bound)  # Linear weight (V, E)
    b = jax.random.uniform(k4, (vocab_size,), jnp.float32, -bound, bound)             # Linear bias (V,)

    idx = jax.random.randint(k5, (B, T), 0, vocab_size, dtype=jnp.int32)

    # One-time fold (per the review: hoisted out of the per-call forward path).
    params = precompute_bigram_params(tok_table, pos_table, w, b, max_positions=T)

    logits, loss = bigram_forward(idx, params)
    logits = jax.block_until_ready(logits)

    # Pure-JAX reference check of the forward semantics.
    ref_x = tok_table[idx] + pos_table[:T][None, :, :]
    ref = jnp.einsum("bte,ve->btv", ref_x, w, precision=lax.Precision.HIGHEST) + b
    assert logits.shape == (B, T, vocab_size)
    assert loss is None
    assert jnp.allclose(logits, ref, atol=1e-4, rtol=1e-4), "mismatch vs reference"

    print("KERNEL_OK")
</pallas_src>

<mosaic_0001>
module attributes {stable_mosaic.version = 11 : i64} {
  func.func @bigram_fused_kernel(%arg0: i32, %arg1: memref<16x1xi32, #tpu.memory_space<vmem>>, %arg2: memref<16x1xi32, #tpu.memory_space<vmem>>, %arg3: memref<128x128xf32, #tpu.memory_space<vmem>>, %arg4: memref<16x128xf32, #tpu.memory_space<vmem>>) attributes {dimension_semantics = [#tpu.dimension_semantics<parallel>], iteration_bounds = array<i64: 1>, scalar_prefetch = 0 : i64, scratch_operands = 0 : i64, tpu.core_type = #tpu.core_type<tc>, window_params = [{transform_indices = @transform_0, window_bounds = array<i64: 16, 1>}, {transform_indices = @transform_1, window_bounds = array<i64: 16, 1>}, {pipeline_mode = #tpu.pipeline_mode<synchronous>, transform_indices = @transform_2, window_bounds = array<i64: 128, 128>}, {transform_indices = @transform_3, window_bounds = array<i64: 16, 128>}]} {
    %0 = tpu.iota {dimensions = array<i32: 1>} : vector<16x128xi32>
    %c0 = arith.constant 0 : index
    %c0_0 = arith.constant 0 : index
    %1 = vector.load %arg1[%c0, %c0_0] : memref<16x1xi32, #tpu.memory_space<vmem>>, vector<16x1xi32>
    %2 = vector.broadcast %1 : vector<16x1xi32> to vector<16x128xi32>
    %3 = arith.cmpi eq, %0, %2 : vector<16x128xi32>
    %c0_1 = arith.constant 0 : index
    %c0_2 = arith.constant 0 : index
    %4 = vector.load %arg2[%c0_1, %c0_2] : memref<16x1xi32, #tpu.memory_space<vmem>>, vector<16x1xi32>
    %5 = vector.broadcast %4 : vector<16x1xi32> to vector<16x128xi32>
    %6 = arith.cmpi eq, %0, %5 : vector<16x128xi32>
    %7 = arith.ori %3, %6 : vector<16x128xi1>
    %8 = arith.extui %7 : vector<16x128xi1> to vector<16x128xi32>
    %9 = arith.sitofp %8 : vector<16x128xi32> to vector<16x128xf32>
    %c0_3 = arith.constant 0 : index
    %c0_4 = arith.constant 0 : index
    %10 = vector.load %arg3[%c0_3, %c0_4] : memref<128x128xf32, #tpu.memory_space<vmem>>, vector<128x128xf32>
    %cst = arith.constant dense<0.000000e+00> : vector<16x128xf32>
    %11 = tpu.matmul %9, %10, %cst {dimension_numbers = #tpu.dot_dimension_numbers<[1], [0], [0], [1], [0, 0, 1, 1], [], []>} : vector<16x128xf32>, vector<128x128xf32>, vector<16x128xf32> -> vector<16x128xf32>
    %c0_5 = arith.constant 0 : index
    %c0_6 = arith.constant 0 : index
    %12 = vector.load %arg4[%c0_5, %c0_6] : memref<16x128xf32, #tpu.memory_space<vmem>>, vector<16x128xf32>
    tpu.vector_store %arg4[%c0_5, %c0_6], %11 {strides = array<i32>} : memref<16x128xf32, #tpu.memory_space<vmem>>, vector<16x128xf32>,
    return
  }
  func.func @transform_0(%arg0: i32) -> (i32, i32) {
    %c0_i32 = arith.constant 0 : i32
    %c0_i32_0 = arith.constant 0 : i32
    return %arg0, %c0_i32 : i32, i32
  }
  func.func @transform_1(%arg0: i32) -> (i32, i32) {
    %c0_i32 = arith.constant 0 : i32
    %c0_i32_0 = arith.constant 0 : i32
    return %arg0, %c0_i32 : i32, i32
  }
  func.func @transform_2(%arg0: i32) -> (i32, i32) {
    %c0_i32 = arith.constant 0 : i32
    %c0_i32_0 = arith.constant 0 : i32
    %c0_i32_1 = arith.constant 0 : i32
    return %c0_i32, %c0_i32_0 : i32, i32
  }
  func.func @transform_3(%arg0: i32) -> (i32, i32) {
    %c0_i32 = arith.constant 0 : i32
    %c0_i32_0 = arith.constant 0 : i32
    return %arg0, %c0_i32 : i32, i32
  }
}

</mosaic_0001>

<bundles_post_ra>
// kernel: tpu_custom_call.1
= control target key start
LH: loop header
LB: loop body
LE: loop exit
PB: predicated region body
PF: predicated region fallthrough
CT: control target
= control target key end

     0   :  { %8 = vsyncpa [#allocation3], 0  ;;  %s380_s0 = inlined_call_operand.vmem [shape: s32[16,1], index: 0, kind: input, shape index: {}]   ;;  %s381_s1 = inlined_call_operand.vmem [shape: s32[16,1], index: 1, kind: input, shape index: {}]   ;;  %s382_s2 = inlined_call_operand.hbm [shape: f32[128,128], index: 2, kind: input, shape index: {}]   ;;  %s383_s3 = inlined_call_operand.hbm [shape: f32[16,128], index: 3, kind: output, shape index: {}]  }
   0x1   :  { %9 = vsyncpa [#allocation4], 0  ;;  %s312_s12 = smov [#allocation2]   ;;  %s264_s16 = scalar_lea.hbm %s382_s2, 2048 }
   0x2   :  { %s19_s13 = sshll.u32 %s312_s12, 4  ;;  %p265_p0 = scmp.ne.s32.totalorder %s382_s2, %s264_s16  ;;  %s20_s13 = int_to_ptr.vmem [resolvable:$true] %s19_s13 }
   0x3   :  { %p268_p1 = scmp.lt.u32.totalorder %s264_s16, %s382_s2 }
   0x5   :  { %p270_p2 = pnand %p268_p1, %p265_p0 }
   0x7   :  { %273 = shalt.err (!%p270_p2)
}
   0x8   :  { %s274_s21 = scalar_lea.vmem %s20_s13, 2048  ;;  %p279_p4 = scmp.lt.s32.totalorder %s20_s13, %s20_s13 }
   0x9   :  { %p275_p3 = scmp.ne.s32.totalorder %s20_s13, %s274_s21  ;;  %p280_p5 = scmp.lt.s32.totalorder %s274_s21, %s274_s21 }
   0xb   :  { %p281_p6 = por %p280_p5, %p279_p4 }
   0xd   :  { %p282_p7 = pnand %p281_p6, %p275_p3 }
   0xf   :  { %285 = shalt.err (!%p282_p7)
}
  0x10   :  { %s313_s22 = smov 128   ;;  %s314_s23 = smov 8  }
  0x11   :  { %25 = dma.hbm_to_vmem [thread:$0]  %s382_s2, 2048, %s20_s13, [#allocation3], %s313_s22, %s313_s22, %s314_s23  }
  0x12   :  { %308 = dma.done.wait [#allocation3], 2048  }
  0x13   :  { %309 = vsyncadd [#allocation3], 4294965248  ;;  %v315_v0 = vmov 0   ;;  %v32_v1 = vld [vmem:[%s380_s0 + $0x8] sm:$0xff]  ;;  %v31_v2 = vld [vmem:[%s380_s0] sm:$0xff]  ;;  %v29_v29 = vlaneseq  ;;  %v316_v35 = vmov 1.0  }
  0x14   :  { %263 = vset.pattern.permute.xlu1 %v315_v0  ;;  %262 = vset.pattern.permute.xlu0 %v315_v0  ;;  %v42_v3 = vld [vmem:[%s381_s1 + $0x8] sm:$0xff]  ;;  %v57_v4 = vld [vmem:[#allocation2] sm:$0xff]  ;;  %v59_v8 = vld [vmem:[#allocation2 + $0x10] sm:$0xff]  ;;  %s317_s0 = smov [#allocation5]  }
  0x15   :  { %37 = vperm.xlu1 %263, %v32_v1   ;;  %34 = vperm.xlu0 %262, %v31_v2   ;;  %v58_v5 = vld [vmem:[#allocation2 + $0x8] sm:$0xff]  ;;  %v41_v6 = vld [vmem:[%s381_s1] sm:$0xff]  ;;  %v60_v9 = vld [vmem:[#allocation2 + $0x18] sm:$0xff]  ;;  %v30_v32 = vand.u32 127, %v29_v29  ;;  %s155_s1 = sshll.u32 %s317_s0, 4  ;;  %s156_s1 = int_to_ptr.vmem [resolvable:$true] %s155_s1 }
  0x16   :  { %v224_v7 = vpack.c.bf16 %v58_v5, %v57_v4  ;;  %v228_v10 = vpack.c.bf16 %v60_v9, %v59_v8  ;;  %v61_v11 = vld [vmem:[#allocation2 + $0x20] sm:$0xff]  ;;  %v62_v12 = vld [vmem:[#allocation2 + $0x28] sm:$0xff]  ;;  %v63_v14 = vld [vmem:[#allocation2 + $0x30] sm:$0xff]  ;;  %s286_s6 = scalar_lea.vmem %s156_s1, 256  ;;  %p291_p9 = scmp.lt.s32.totalorder %s156_s1, %s156_s1 }
  0x17   :  { %v232_v13 = vpack.c.bf16 %v62_v12, %v61_v11  ;;  %v64_v15 = vld [vmem:[#allocation2 + $0x38] sm:$0xff]  ;;  %v65_v17 = vld [vmem:[#allocation2 + $0x40] sm:$0xff]  ;;  %v66_v18 = vld [vmem:[#allocation2 + $0x48] sm:$0xff]  ;;  %p287_p8 = scmp.ne.s32.totalorder %s156_s1, %s286_s6  ;;  %p292_p10 = scmp.lt.s32.totalorder %s286_s6, %s286_s6 }
  0x18   :  { %225 = vmatprep.subr.bf16.mxu0 %v224_v7  ;;  %v236_v16 = vpack.c.bf16 %v64_v15, %v63_v14  ;;  %v240_v19 = vpack.c.bf16 %v66_v18, %v65_v17  ;;  %v67_v20 = vld [vmem:[#allocation2 + $0x50] sm:$0xff]  ;;  %v68_v21 = vld [vmem:[#allocation2 + $0x58] sm:$0xff]  ;;  %v69_v23 = vld [vmem:[#allocation2 + $0x60] sm:$0xff] }
  0x19   :  { %47 = vperm.xlu1 %263, %v42_v3   ;;  %44 = vperm.xlu0 %262, %v41_v6   ;;  %v244_v22 = vpack.c.bf16 %v68_v21, %v67_v20  ;;  %v70_v24 = vld [vmem:[#allocation2 + $0x68] sm:$0xff]  ;;  %v71_v26 = vld [vmem:[#allocation2 + $0x70] sm:$0xff]  ;;  %v72_v27 = vld [vmem:[#allocation2 + $0x78] sm:$0xff]  ;;  %p293_p11 = por %p292_p10, %p291_p9 }
  0x1a   :  { %227 = vmatpush3.bf16.msra.mxu0 %v224_v7  ;;  %v248_v25 = vpack.c.bf16 %v70_v24, %v69_v23  ;;  %v252_v28 = vpack.c.bf16 %v72_v27, %v71_v26 }
  0x1b   :  { %229 = vmatprep.subr.bf16.mxu0 %v228_v10  ;;  %p294_p12 = pnand %p293_p11, %p287_p8 }
  0x1e   :  { %231 = vmatpush3.bf16.msra.mxu0 %v228_v10 }
  0x1f   :  { %233 = vmatprep.subr.bf16.mxu0 %v232_v13 }
  0x22   :  { %235 = vmatpush3.bf16.msra.mxu0 %v232_v13 }
  0x23   :  { %237 = vmatprep.subr.bf16.mxu0 %v236_v16 }
  0x26   :  { %239 = vmatpush3.bf16.msra.mxu0 %v236_v16 }
  0x27   :  { %241 = vmatprep.subr.bf16.mxu0 %v240_v19 }
  0x2a   :  { %243 = vmatpush3.bf16.msra.mxu0 %v240_v19 }
  0x2b   :  { %245 = vmatprep.subr.bf16.mxu0 %v244_v22 }
  0x2e   :  { %247 = vmatpush3.bf16.msra.mxu0 %v244_v22 }
  0x2f   :  { %249 = vmatprep.subr.bf16.mxu0 %v248_v25 }
  0x32   :  { %251 = vmatpush3.bf16.msra.mxu0 %v248_v25 }
  0x33   :  { %253 = vmatprep.subr.bf16.mxu0 %v252_v28 }
  0x36   :  { %255 = vmatpush3.bf16.msra.mxu0 %v252_v28 }
  0x94   :  { %v38_v30 = vpop.permute.xlu1 %37  ;;  %v35_v31 = vpop.permute.xlu0 %34 }
  0x95   :  { %vm40_vm0 = vcmp.eq.s32.totalorder %v30_v32, %v38_v30  ;;  %vm39_vm3 = vcmp.eq.s32.totalorder %v30_v32, %v35_v31 }
  0x98   :  { %v48_v33 = vpop.permute.xlu1 %47  ;;  %v45_v34 = vpop.permute.xlu0 %44 }
  0x99   :  { %vm50_vm1 = vcmp.eq.s32.totalorder %v30_v32, %v48_v33  ;;  %vm49_vm2 = vcmp.eq.s32.totalorder %v30_v32, %v45_v34 }
  0x9a   :  { %vm52_vm4 = vmor %vm40_vm0, %vm50_vm1 }
  0x9b   :  { %vm51_vm5 = vmor %vm39_vm3, %vm49_vm2 }
  0x9c   :  { %221 = vmatprep.mubr.msk.f32.mxu0 %vm51_vm5, %v316_v35 }
  0x9d   :  { %222 = vmatmul.mubr.msk.f32.vlgmr.msra.gmra.mrb[0].mxu0 %vm52_vm4, %v316_v35 }
 0x170   :  { %v223_v36 = vpop.f32.mrb[0].mxu0 }
 0x171   :  { %149 = vst [vmem:[#allocation5 + $0x8] sm:$0xff] %v223_v36  ;;  %v139_v37 = vpop.f32.mrb[1].mxu0 }
 0x172   :  { %148 = vst [vmem:[#allocation5] sm:$0xff] %v139_v37 }
 0x173   :  { %297 = shalt.err (!%p294_p12)
}
 0x174   :  { %s298_s9 = scalar_lea.hbm %s383_s3, 256 }
 0x175   :  { %p299_p13 = scmp.ne.s32.totalorder %s383_s3, %s298_s9  ;;  %p302_p0 = scmp.lt.u32.totalorder %s298_s9, %s383_s3 }
 0x177   :  { %p304_p1 = pnand %p302_p0, %p299_p13 }
 0x179   :  { %307 = shalt.err (!%p304_p1)
}
 0x17a   :  { %161 = dma.vmem_to_hbm [thread:$0]  %s156_s1, 256, %s383_s3, [#allocation4], %s313_s22, %s313_s22, %s314_s23  }
 0x17b   :  { %310 = dma.done.wait [#allocation4], 256  }
 0x17c   :  { %311 = vsyncadd [#allocation4], 4294967040 }
 0x17d   :  { %165 = vsyncpa [#allocation3], 1 }
 0x17e   :  { %166 = vsyncpa [#allocation4], 1 }

</bundles_post_ra>
